<compile_context>
chip_gen: v7x
topology: tpu7x:2x2x1
jax: 0.10.0
libtpu: 0.0.40
codegen_flags: <defaults>
</compile_context>

<pallas_src>
import functools

import jax
import jax.numpy as jnp
from jax.experimental import pallas as pl
from jax.experimental.pallas import tpu as pltpu


MATMUL_DTYPE = jnp.bfloat16        # MXU operand dtype (f32 accumulation)
VMEM_LIMIT = 48 * 1024 * 1024      # sized under v7x's 64 MiB/TC budget


# ----------------------------------------------------------------------------
# In-kernel math helpers (pure jnp, traced inside the Pallas kernels)
# ----------------------------------------------------------------------------
def _gelu(x):
    # tanh-form GELU: the tanh goes to the EUP slot instead of ~10 VALU ops.
    c = 0.7978845608028654  # sqrt(2/pi)
    return 0.5 * x * (1.0 + jnp.tanh(c * (x + 0.044715 * x * x * x)))


def _layernorm(x, gamma, beta, eps=1e-5):
    mu = jnp.mean(x, axis=-1, keepdims=True)
    var = jnp.mean((x - mu) * (x - mu), axis=-1, keepdims=True)
    return (x - mu) * jax.lax.rsqrt(var + eps) * gamma + beta


# ----------------------------------------------------------------------------
# Kernel 1: patch embedding (8x8/stride-8 conv == per-patch linear) + pos-embed
# ----------------------------------------------------------------------------
def _patch_embed_kernel(patch_ref, w_ref, b_ref, pos_ref, out_ref, *, B):
    emb = jnp.dot(patch_ref[...], w_ref[...],
                  preferred_element_type=jnp.float32) + b_ref[...]
    pt, e = pos_ref.shape
    # rows are patch-major (p*B + b): broadcast each pos row over the B axis.
    pos = jnp.broadcast_to(pos_ref[...][:, None, :], (pt, B, e)).reshape(pt * B, e)
    out_ref[...] = emb + pos


def patch_embed_call(patches, w, b, pos, *, B, P, pt):
    n, k = patches.shape
    e = w.shape[1]
    tm = pt * B
    return pl.pallas_call(
        functools.partial(_patch_embed_kernel, B=B),
        out_shape=jax.ShapeDtypeStruct((n, e), jnp.float32),
        grid=(P // pt,),
        in_specs=[
            pl.BlockSpec((tm, k), lambda i: (i, 0)),
            pl.BlockSpec((k, e), lambda i: (0, 0)),
            pl.BlockSpec((1, e), lambda i: (0, 0)),
            pl.BlockSpec((pt, e), lambda i: (i, 0)),
        ],
        out_specs=pl.BlockSpec((tm, e), lambda i: (i, 0)),
        compiler_params=pltpu.CompilerParams(
            dimension_semantics=("parallel",),
            vmem_limit_bytes=VMEM_LIMIT),
    )(patches, w, b, pos)


# ----------------------------------------------------------------------------
# Kernel 2: ALL transformer blocks fused (MHA + LN + MLP + LN per layer).
#   grid = (row_tiles, num_layers); the residual stream lives in the revisited
#   output VMEM block across the (arbitrary) layer axis.
# ----------------------------------------------------------------------------
def _hvt_blocks_kernel(x_ref, w_in_ref, b_in_ref, w_out_ref, b_out_ref,
                       g1_ref, be1_ref, w1_ref, b1_ref, w2_ref, b2_ref,
                       g2_ref, be2_ref, out_ref, *, B, H):
    layer = pl.program_id(1)

    @pl.when(layer == 0)
    def _():
        out_ref[...] = x_ref[...]          # seed the resident residual stream

    x = out_ref[...]                        # (TM, E) float32
    tm, E = x.shape
    D = E // H
    pt = tm // B
    scale = 1.0 / float(D) ** 0.5

    w_in = w_in_ref[...]
    w_out = w_out_ref[...]

    # --- fused QKV projection (bf16 operands, f32 accumulation) --------------
    qkv = jnp.dot(x.astype(w_in.dtype), w_in,
                  preferred_element_type=jnp.float32) + b_in_ref[...]

    # --- attention over the batch axis (length B), batched over (patch, head)
    #     rows are patch-major, so each attention group is B contiguous rows.
    attn = jnp.zeros((tm, E), jnp.float32)
    for h in range(H):                      # H is a small static model constant
        qh = (qkv[:, h * D:(h + 1) * D] * scale).reshape(pt, B, D)
        kh = qkv[:, E + h * D:E + (h + 1) * D].reshape(pt, B, D)
        vh = qkv[:, 2 * E + h * D:2 * E + (h + 1) * D].reshape(pt, B, D)

        s = jnp.einsum('pid,pjd->pij', qh, kh,
                       preferred_element_type=jnp.float32)          # (pt,B,B)
        m = jnp.max(s, axis=-1, keepdims=True)
        e = jnp.exp(s - m)
        inv = pl.reciprocal(jnp.sum(e, axis=-1, keepdims=True), approx=True)
        prob = e * inv
        oh = jnp.einsum('pij,pjd->pid', prob, vh,
                        preferred_element_type=jnp.float32)          # (pt,B,D)

        # out-projection folded per head: concat_h(oh) @ W == sum_h oh @ W[hD:]
        attn = attn + jnp.dot(oh.reshape(tm, D).astype(w_out.dtype),
                              w_out[h * D:(h + 1) * D, :],
                              preferred_element_type=jnp.float32)
    attn = attn + b_out_ref[...]

    # --- residual + LayerNorm 1 ----------------------------------------------
    y = _layernorm(x + attn, g1_ref[...], be1_ref[...])

    # --- MLP ------------------------------------------------------------------
    w1 = w1_ref[...]
    w2 = w2_ref[...]
    hmid = jnp.dot(y.astype(w1.dtype), w1,
                   preferred_element_type=jnp.float32) + b1_ref[...]
    hmid = _gelu(hmid)
    mlp = jnp.dot(hmid.astype(w2.dtype), w2,
                  preferred_element_type=jnp.float32) + b2_ref[...]

    # --- residual + LayerNorm 2 (stays resident for the next layer) ----------
    out_ref[...] = _layernorm(y + mlp, g2_ref[...], be2_ref[...])


def hvt_blocks_call(x, blocks, *, B, P, H, pt, num_blocks):
    n, e = x.shape
    tm = pt * B
    row = lambda i, l: (i, 0)
    lay = lambda i, l: (l, 0, 0)

    def wspec(shape):
        return pl.BlockSpec((None,) + shape, lay)   # squeeze the layer axis

    in_specs = [
        pl.BlockSpec((tm, e), row),
        wspec((e, 3 * e)), wspec((1, 3 * e)),
        wspec((e, e)), wspec((1, e)),
        wspec((1, e)), wspec((1, e)),
        wspec((e, 4 * e)), wspec((1, 4 * e)),
        wspec((4 * e, e)), wspec((1, e)),
        wspec((1, e)), wspec((1, e)),
    ]
    return pl.pallas_call(
        functools.partial(_hvt_blocks_kernel, B=B, H=H),
        out_shape=jax.ShapeDtypeStruct((n, e), jnp.float32),
        grid=(P // pt, num_blocks),
        in_specs=in_specs,
        out_specs=pl.BlockSpec((tm, e), row),
        compiler_params=pltpu.CompilerParams(
            dimension_semantics=("parallel", "arbitrary"),
            vmem_limit_bytes=VMEM_LIMIT),
    )(x, blocks["w_in"], blocks["b_in"], blocks["w_out"], blocks["b_out"],
      blocks["ln1_g"], blocks["ln1_b"], blocks["w1"], blocks["b1"],
      blocks["w2"], blocks["b2"], blocks["ln2_g"], blocks["ln2_b"])


# ----------------------------------------------------------------------------
# Kernel 3: mean-pool over patches (single pooling matmul) + projection head
# ----------------------------------------------------------------------------
def _head_kernel(x_ref, pool_ref, w1_ref, b1_ref, w2_ref, b2_ref, out_ref):
    pooled = jnp.dot(pool_ref[...], x_ref[...],
                     preferred_element_type=jnp.float32)             # (B, E)
    h = jnp.dot(pooled, w1_ref[...],
                preferred_element_type=jnp.float32) + b1_ref[...]
    h = jnp.maximum(h, 0.0)
    out_ref[...] = jnp.dot(h, w2_ref[...],
                           preferred_element_type=jnp.float32) + b2_ref[...]


def head_call(x, pool, w1, b1, w2, b2):
    b = pool.shape[0]
    out_dim = w2.shape[1]
    vmem = pl.BlockSpec(memory_space=pltpu.MemorySpace.VMEM)
    return pl.pallas_call(
        _head_kernel,
        out_shape=jax.ShapeDtypeStruct((b, out_dim), jnp.float32),
        in_specs=[vmem] * 6,
        out_specs=vmem,
        compiler_params=pltpu.CompilerParams(vmem_limit_bytes=VMEM_LIMIT),
    )(x, pool, w1, b1, w2, b2)


# ----------------------------------------------------------------------------
# Glue: patch extraction, tiling choice, parameters, forward pass
# ----------------------------------------------------------------------------
def extract_patches(rgb, patch=8):
    # rgb: (B, C, H, W) NCHW -> (P*B, C*patch*patch), patch-major rows
    # (row = p*B + b), feature order (C, ph, pw) to match Conv2d weights.
    b, c, hgt, wid = rgb.shape
    gh, gw = hgt // patch, wid // patch
    x = rgb.reshape(b, c, gh, patch, gw, patch)
    x = x.transpose(2, 4, 0, 1, 3, 5)          # (gh, gw, B, C, ph, pw)
    return x.reshape(gh * gw * b, c * patch * patch)


def _row_tile(P, B, max_rows=512):
    # Patches per row tile: keep whole attention groups (B rows) together and
    # keep the tile (8,128)-friendly.  Toy shapes -> no tiling (pt == P).
    cap = max(1, max_rows // max(B, 1))
    if P <= cap:
        return P
    for pt in range(min(P, cap), 7, -1):
        if P % pt == 0 and pt % 8 == 0:
            return pt
    return P


def build_params(key, img_size=(16, 16), embed_dim=128, num_heads=4,
                 num_blocks=2):
    patch = 8
    P = (img_size[0] // patch) * (img_size[1] // patch)
    E, H, L = embed_dim, num_heads, num_blocks
    K = 3 * patch * patch
    keys = iter(jax.random.split(key, 8))

    def nrm(shape, dtype=jnp.float32):
        return (0.02 * jax.random.normal(next(keys), shape,
                                         jnp.float32)).astype(dtype)

    mm = MATMUL_DTYPE
    return {
        "cfg": {"patch": patch, "P": P, "E": E, "H": H, "L": L},
        # Conv2d(3, E, 8, 8) weight flattened (E, 3*8*8) -> transposed (K, E)
        "patch_w": nrm((K, E)),
        "patch_b": jnp.zeros((1, E), jnp.float32),
        "pos_embed": nrm((P, E)),                       # trunc_normal(0.02)
        "head_w1": nrm((E, 2 * E)),
        "head_b1": jnp.zeros((1, 2 * E), jnp.float32),
        "head_w2": nrm((2 * E, 256)),
        "head_b2": jnp.zeros((1, 256), jnp.float32),
        # Per-block weights stacked along a leading layer axis.
        "blocks": {
            "w_in": nrm((L, E, 3 * E), mm),             # in_proj_weight.T
            "b_in": jnp.zeros((L, 1, 3 * E), jnp.float32),
            "w_out": nrm((L, E, E), mm),                # out_proj.weight.T
            "b_out": jnp.zeros((L, 1, E), jnp.float32),
            "ln1_g": jnp.ones((L, 1, E), jnp.float32),
            "ln1_b": jnp.zeros((L, 1, E), jnp.float32),
            "w1": nrm((L, E, 4 * E), mm),
            "b1": jnp.zeros((L, 1, 4 * E), jnp.float32),
            "w2": nrm((L, 4 * E, E), mm),
            "b2": jnp.zeros((L, 1, E), jnp.float32),
            "ln2_g": jnp.ones((L, 1, E), jnp.float32),
            "ln2_b": jnp.zeros((L, 1, E), jnp.float32),
        },
    }


def hvt_forward(params, rgb, pretrain=True):
    cfg = params["cfg"]
    B = rgb.shape[0]
    P, E, H, L = cfg["P"], cfg["E"], cfg["H"], cfg["L"]

    patches = extract_patches(rgb.astype(jnp.float32), cfg["patch"])
    pt = _row_tile(P, B)

    x = patch_embed_call(patches, params["patch_w"], params["patch_b"],
                         params["pos_embed"], B=B, P=P, pt=pt)      # (P*B, E)

    # torch.utils.checkpoint only changes backward-pass memory; the forward
    # math is identical, so all blocks run inside one fused pallas_call.
    x = hvt_blocks_call(x, params["blocks"], B=B, P=P, H=H, pt=pt,
                        num_blocks=L)

    if pretrain:
        # mean over patches as one (B, P*B) pooling matmul (patch-major rows).
        pool = jnp.tile(jnp.eye(B, dtype=jnp.float32), (1, P)) / float(P)
        return head_call(x, pool, params["head_w1"], params["head_b1"],
                         params["head_w2"], params["head_b2"])
    return x.reshape(P, B, E).transpose(1, 0, 2)                     # (B, P, E)


if __name__ == "__main__":
    key = jax.random.PRNGKey(0)
    k_param, k_input = jax.random.split(key)

    img_size = (16, 16)
    params = build_params(k_param, img_size=img_size, embed_dim=128,
                          num_heads=4, num_blocks=2)
    rgb = jax.random.normal(k_input, (2, 3, img_size[0], img_size[1]),
                            jnp.float32)

    out = hvt_forward(params, rgb, pretrain=True)
    out = jax.block_until_ready(out)

    assert out.shape == (2, 256), out.shape
    assert bool(jnp.all(jnp.isfinite(out))), "non-finite output"
    print("KERNEL_OK")
</pallas_src>

<mosaic_0001>
module attributes {stable_mosaic.version = 11 : i64} {
  func.func @_patch_embed_kernel(%arg0: i32, %arg1: memref<8x192xf32, #tpu.memory_space<vmem>>, %arg2: memref<192x128xf32, #tpu.memory_space<vmem>>, %arg3: memref<1x128xf32, #tpu.memory_space<vmem>>, %arg4: memref<4x128xf32, #tpu.memory_space<vmem>>, %arg5: memref<8x128xf32, #tpu.memory_space<vmem>>) attributes {dimension_semantics = [#tpu.dimension_semantics<parallel>], iteration_bounds = array<i64: 1>, scalar_prefetch = 0 : i64, scratch_operands = 0 : i64, tpu.core_type = #tpu.core_type<tc>, window_params = [{transform_indices = @transform_0, window_bounds = array<i64: 8, 192>}, {pipeline_mode = #tpu.pipeline_mode<synchronous>, transform_indices = @transform_1, window_bounds = array<i64: 192, 128>}, {pipeline_mode = #tpu.pipeline_mode<synchronous>, transform_indices = @transform_2, window_bounds = array<i64: 1, 128>}, {transform_indices = @transform_3, window_bounds = array<i64: 4, 128>}, {transform_indices = @transform_4, window_bounds = array<i64: 8, 128>}]} {
    %c0 = arith.constant 0 : index
    %c0_0 = arith.constant 0 : index
    %0 = vector.load %arg1[%c0, %c0_0] : memref<8x192xf32, #tpu.memory_space<vmem>>, vector<8x192xf32>
    %c0_1 = arith.constant 0 : index
    %c0_2 = arith.constant 0 : index
    %1 = vector.load %arg2[%c0_1, %c0_2] : memref<192x128xf32, #tpu.memory_space<vmem>>, vector<192x128xf32>
    %cst = arith.constant dense<0.000000e+00> : vector<8x128xf32>
    %2 = tpu.matmul %0, %1, %cst {dimension_numbers = #tpu.dot_dimension_numbers<[1], [0], [0], [1], [0, 0, 1, 1], [], []>} : vector<8x192xf32>, vector<192x128xf32>, vector<8x128xf32> -> vector<8x128xf32>
    %c0_3 = arith.constant 0 : index
    %c0_4 = arith.constant 0 : index
    %3 = vector.load %arg3[%c0_3, %c0_4] : memref<1x128xf32, #tpu.memory_space<vmem>>, vector<1x128xf32>
    %4 = vector.broadcast %3 : vector<1x128xf32> to vector<8x128xf32>
    %5 = arith.addf %2, %4 : vector<8x128xf32>
    %c0_5 = arith.constant 0 : index
    %c0_6 = arith.constant 0 : index
    %6 = vector.load %arg4[%c0_5, %c0_6] : memref<4x128xf32, #tpu.memory_space<vmem>>, vector<4x128xf32>
    %7 = vector.shape_cast %6 : vector<4x128xf32> to vector<4x1x128xf32>
    %8 = vector.shape_cast %7 : vector<4x1x128xf32> to vector<4x1x128xf32>
    %9 = vector.broadcast %8 : vector<4x1x128xf32> to vector<4x2x128xf32>
    %10 = vector.shape_cast %9 : vector<4x2x128xf32> to vector<8x128xf32>
    %11 = arith.addf %5, %10 : vector<8x128xf32>
    %c0_7 = arith.constant 0 : index
    %c0_8 = arith.constant 0 : index
    %12 = vector.load %arg5[%c0_7, %c0_8] : memref<8x128xf32, #tpu.memory_space<vmem>>, vector<8x128xf32>
    tpu.vector_store %arg5[%c0_7, %c0_8], %11 {strides = array<i32>} : memref<8x128xf32, #tpu.memory_space<vmem>>, vector<8x128xf32>,
    return
  }
  func.func @transform_0(%arg0: i32) -> (i32, i32) {
    %c0_i32 = arith.constant 0 : i32
    %c0_i32_0 = arith.constant 0 : i32
    return %arg0, %c0_i32 : i32, i32
  }
  func.func @transform_1(%arg0: i32) -> (i32, i32) {
    %c0_i32 = arith.constant 0 : i32
    %c0_i32_0 = arith.constant 0 : i32
    %c0_i32_1 = arith.constant 0 : i32
    return %c0_i32, %c0_i32_0 : i32, i32
  }
  func.func @transform_2(%arg0: i32) -> (i32, i32) {
    %c0_i32 = arith.constant 0 : i32
    %c0_i32_0 = arith.constant 0 : i32
    %c0_i32_1 = arith.constant 0 : i32
    return %c0_i32, %c0_i32_0 : i32, i32
  }
  func.func @transform_3(%arg0: i32) -> (i32, i32) {
    %c0_i32 = arith.constant 0 : i32
    %c0_i32_0 = arith.constant 0 : i32
    return %arg0, %c0_i32 : i32, i32
  }
  func.func @transform_4(%arg0: i32) -> (i32, i32) {
    %c0_i32 = arith.constant 0 : i32
    %c0_i32_0 = arith.constant 0 : i32
    return %arg0, %c0_i32 : i32, i32
  }
}

</mosaic_0001>

<bundles_post_ra>
// kernel: tpu_custom_call.1
= control target key start
LH: loop header
LB: loop body
LE: loop exit
PB: predicated region body
PF: predicated region fallthrough
CT: control target
= control target key end

     0   :  { %9 = vsyncpa [#allocation3], 0  ;;  %s430_s0 = inlined_call_operand.hbm [shape: f32[8,192], index: 0, kind: input, shape index: {}]   ;;  %s431_s1 = inlined_call_operand.hbm [shape: f32[192,128], index: 1, kind: input, shape index: {}]   ;;  %s432_s2 = inlined_call_operand.vmem [shape: f32[1,128], index: 2, kind: input, shape index: {}]   ;;  %s433_s3 = inlined_call_operand.vmem [shape: f32[4,128], index: 3, kind: input, shape index: {}]   ;;  %s434_s4 = inlined_call_operand.hbm [shape: f32[8,128], index: 4, kind: output, shape index: {}]  }
   0x1   :  { %10 = vsyncpa [#allocation6], 0 }
   0x2   :  { %11 = vsyncpa [#allocation4], 0  ;;  %s348_s15 = smov [#allocation2]   ;;  %s349_s17 = smov [#allocation5]  }
   0x3   :  { %s18_s16 = sshll.u32 %s348_s15, 4  ;;  %s27_s18 = sshll.u32 %s349_s17, 4  ;;  %s19_s16 = int_to_ptr.vmem [resolvable:$true] %s18_s16  ;;  %s381_s18 = int_to_ptr.vmem [resolvable:$true] %s27_s18 }
   0x4   :  { %s276_s21 = scalar_lea.hbm %s430_s0, 256 }
   0x5   :  { %p277_p0 = scmp.ne.s32.totalorder %s430_s0, %s276_s21  ;;  %p280_p1 = scmp.lt.u32.totalorder %s276_s21, %s430_s0 }
   0x7   :  { %p282_p2 = pnand %p280_p1, %p277_p0 }
   0x9   :  { %285 = shalt.err (!%p282_p2)
}
   0xa   :  { %s286_s26 = scalar_lea.vmem %s19_s16, 256  ;;  %p291_p4 = scmp.lt.s32.totalorder %s19_s16, %s19_s16 }
   0xb   :  { %p287_p3 = scmp.ne.s32.totalorder %s19_s16, %s286_s26  ;;  %p292_p5 = scmp.lt.s32.totalorder %s286_s26, %s286_s26 }
   0xd   :  { %p293_p6 = por %p292_p5, %p291_p4 }
   0xf   :  { %p294_p7 = pnand %p293_p6, %p287_p3 }
  0x11   :  { %297 = shalt.err (!%p294_p7)
}
  0x12   :  { %21 = dma.hbm_to_vmem [thread:$0]  %s430_s0, 256, %s19_s16, [#allocation3]  }
  0x13   :  { %s298_s5 = scalar_lea.hbm %s431_s1, 3072 }
  0x14   :  { %p299_p8 = scmp.ne.s32.totalorder %s431_s1, %s298_s5  ;;  %p302_p9 = scmp.lt.u32.totalorder %s298_s5, %s431_s1 }
  0x16   :  { %p304_p10 = pnand %p302_p9, %p299_p8 }
  0x18   :  { %307 = shalt.err (!%p304_p10)
}
  0x19   :  { %s308_s10 = scalar_lea.vmem %s381_s18, 3072  ;;  %p313_p12 = scmp.lt.s32.totalorder %s381_s18, %s381_s18 }
  0x1a   :  { %p309_p11 = scmp.ne.s32.totalorder %s381_s18, %s308_s10  ;;  %p314_p13 = scmp.lt.s32.totalorder %s308_s10, %s308_s10 }
  0x1c   :  { %p315_p0 = por %p314_p13, %p313_p12 }
  0x1e   :  { %p316_p1 = pnand %p315_p0, %p309_p11 }
  0x20   :  { %319 = shalt.err (!%p316_p1)
}
  0x21   :  { %s350_s0 = smov 128   ;;  %s351_s11 = smov 8  }
  0x22   :  { %33 = dma.hbm_to_vmem [thread:$0]  %s431_s1, 3072, %s381_s18, [#allocation6], %s350_s0, %s350_s0, %s351_s11  }
  0x23   :  { %342 = dma.done.wait [#allocation3], 256  }
  0x24   :  { %343 = vsyncadd [#allocation3], 4294967040 }
  0x25   :  { %344 = dma.done.wait [#allocation6], 3072  }
  0x26   :  { %345 = vsyncadd [#allocation6], 4294964224  ;;  %v352_v0 = vmov 0.0|0.0   ;;  %v46_v1 = vld [vmem:[#allocation5] sm:$0xff]  ;;  %v47_v2 = vld [vmem:[#allocation5 + $0x8] sm:$0xff]  ;;  %vm77_vm0 = vcmask 523264   ;;  %v164_v41 = vlaneseq }
  0x27   :  { %232 = vmatprep.subr.bf16.mxu0 %v352_v0  ;;  %v48_v3 = vld [vmem:[#allocation5 + $0x10] sm:$0xff]  ;;  %v233_v4 = vpack.c.bf16 %v47_v2, %v46_v1  ;;  %v49_v5 = vld [vmem:[#allocation5 + $0x18] sm:$0xff]  ;;  %v50_v7 = vld [vmem:[#allocation5 + $0x20] sm:$0xff]  ;;  %v353_v39 = vmov 1966171168   ;;  %s355_s16 = smov [#allocation7]  }
  0x28   :  { %v236_v6 = vpack.c.bf16 %v49_v5, %v48_v3  ;;  %v51_v8 = vld [vmem:[#allocation5 + $0x28] sm:$0xff]  ;;  %v52_v10 = vld [vmem:[#allocation5 + $0x30] sm:$0xff]  ;;  %v53_v11 = vld [vmem:[#allocation5 + $0x38] sm:$0xff]  ;;  %v162_v40 = vunpack.c.l.s4 %v353_v39  ;;  %v165_v43 = vshrl.u32 %v164_v41, 7  ;;  %v354_v52 = vmov 1983009808  }
  0x29   :  { %234 = vmatpush1.bf16.msra.mxu0 %v233_v4  ;;  %v239_v9 = vpack.c.bf16 %v51_v8, %v50_v7  ;;  %v45_v12 = vld [vmem:[#allocation2 + $0x8] sm:$0xff]  ;;  %v242_v13 = vpack.c.bf16 %v53_v11, %v52_v10  ;;  %v54_v14 = vld [vmem:[#allocation5 + $0x40] sm:$0xff]  ;;  %v55_v15 = vld [vmem:[#allocation5 + $0x48] sm:$0xff]  ;;  %v196_v53 = vunpack.c.l.s4 %v354_v52  ;;  %s219_s17 = sshll.u32 %s355_s16, 4  ;;  %s220_s17 = int_to_ptr.vmem [resolvable:$true] %s219_s17 }
  0x2a   :  { %235 = vmatprep.subr.bf16.mxu0 %v352_v0  ;;  %230 = vmatprep.mubr.msk.f32.mxu0 %vm77_vm0, %v45_v12  ;;  %v245_v16 = vpack.c.bf16 %v55_v15, %v54_v14  ;;  %v56_v17 = vld [vmem:[#allocation5 + $0x50] sm:$0xff]  ;;  %v57_v18 = vld [vmem:[#allocation5 + $0x58] sm:$0xff]  ;;  %v58_v20 = vld [vmem:[#allocation5 + $0x60] sm:$0xff]  ;;  %v163_v42 = vunpack.c.0.s8 %v162_v40  ;;  %v179_v49 = vsub.s32 0, %v165_v43  ;;  %s320_s18 = scalar_lea.vmem %s220_s17, 128  ;;  %p325_p3 = scmp.lt.s32.totalorder %s220_s17, %s220_s17 }
  0x2b   :  { %v248_v19 = vpack.c.bf16 %v57_v18, %v56_v17  ;;  %v59_v21 = vld [vmem:[#allocation5 + $0x68] sm:$0xff]  ;;  %v60_v23 = vld [vmem:[#allocation5 + $0x70] sm:$0xff]  ;;  %v61_v24 = vld [vmem:[#allocation5 + $0x78] sm:$0xff]  ;;  %v197_v58 = vunpack.c.0.s8 %v196_v53  ;;  %p321_p2 = scmp.ne.s32.totalorder %s220_s17, %s320_s18  ;;  %p326_p4 = scmp.lt.s32.totalorder %s320_s18, %s320_s18 }
  0x2c   :  { %v251_v22 = vpack.c.bf16 %v59_v21, %v58_v20  ;;  %v254_v25 = vpack.c.bf16 %v61_v24, %v60_v23  ;;  %v62_v26 = vld [vmem:[#allocation5 + $0x80] sm:$0xff]  ;;  %v63_v27 = vld [vmem:[#allocation5 + $0x88] sm:$0xff]  ;;  %v64_v29 = vld [vmem:[#allocation5 + $0x90] sm:$0xff]  ;;  %v166_v46 = vsub.s32 %v163_v42, %v165_v43 }
  0x2d   :  { %237 = vmatpush1.bf16.msra.mxu0 %v236_v6  ;;  %v257_v28 = vpack.c.bf16 %v63_v27, %v62_v26  ;;  %v65_v30 = vld [vmem:[#allocation5 + $0x98] sm:$0xff]  ;;  %v66_v32 = vld [vmem:[#allocation5 + $0xa0] sm:$0xff]  ;;  %v67_v33 = vld [vmem:[#allocation5 + $0xa8] sm:$0xff]  ;;  %v200_v61 = vsub.s32 %v197_v58, %v165_v43  ;;  %p327_p5 = por %p326_p4, %p325_p3 }
  0x2e   :  { %238 = vmatprep.subr.bf16.mxu0 %v352_v0  ;;  %v260_v31 = vpack.c.bf16 %v65_v30, %v64_v29  ;;  %v263_v34 = vpack.c.bf16 %v67_v33, %v66_v32  ;;  %v68_v35 = vld [vmem:[#allocation5 + $0xb0] sm:$0xff]  ;;  %v69_v36 = vld [vmem:[#allocation5 + $0xb8] sm:$0xff] }
  0x2f   :  { %v266_v37 = vpack.c.bf16 %v69_v36, %v68_v35  ;;  %v44_v38 = vld [vmem:[#allocation2] sm:$0xff]  ;;  %p328_p6 = pnand %p327_p5, %p321_p2 }
  0x30   :  { %v231_v44 = vld.sshfl [vmem:[%s433_s3] sm:$0x33 pattern:$0x75316420] }
  0x31   :  { %240 = vmatpush1.bf16.msra.mxu0 %v239_v9  ;;  %v160_v45 = vcombine.high %v231_v44, %v231_v44  ;;  %v167_v47 = vrot.slane %v231_v44, %v166_v46 }
  0x32   :  { %241 = vmatprep.subr.bf16.mxu0 %v352_v0 }
  0x33   :  { %v174_v48 = vrot.slane %v160_v45, %v166_v46  ;;  %v175_v50 = vcombine.high %v167_v47, %v167_v47  ;;  %v180_v54 = vrot.slane %v167_v47, %v179_v49 }
  0x35   :  { %243 = vmatpush1.bf16.msra.mxu0 %v242_v13  ;;  %v176_v51 = vcombine.high %v174_v48, %v174_v48  ;;  %v184_v55 = vrot.slane %v174_v48, %v179_v49  ;;  %v188_v56 = vrot.slane %v175_v50, %v179_v49 }
  0x36   :  { %244 = vmatprep.subr.bf16.mxu0 %v352_v0 }
  0x37   :  { %v192_v57 = vrot.slane %v176_v51, %v179_v49  ;;  %v193_v59 = vcombine.low %v180_v54, %v184_v55 }
  0x39   :  { %246 = vmatpush1.bf16.msra.mxu0 %v245_v16  ;;  %v194_v60 = vcombine.low %v188_v56, %v192_v57  ;;  %v201_v62 = vrot.slane %v193_v59, %v200_v61 }
  0x3a   :  { %247 = vmatprep.subr.bf16.mxu0 %v352_v0 }
  0x3b   :  { %v208_v63 = vrot.slane %v194_v60, %v200_v61 }
  0x3d   :  { %249 = vmatpush1.bf16.msra.mxu0 %v248_v19  ;;  %v209_v1 = vcombine.low %v201_v62, %v208_v63 }
  0x3e   :  { %250 = vmatprep.subr.bf16.mxu0 %v352_v0 }
  0x41   :  { %252 = vmatpush1.bf16.msra.mxu0 %v251_v22 }
  0x42   :  { %253 = vmatprep.subr.bf16.mxu0 %v352_v0 }
  0x45   :  { %255 = vmatpush1.bf16.msra.mxu0 %v254_v25 }
  0x46   :  { %256 = vmatprep.subr.bf16.mxu0 %v352_v0 }
  0x49   :  { %258 = vmatpush1.bf16.msra.mxu0 %v257_v28 }
  0x4a   :  { %259 = vmatprep.subr.bf16.mxu0 %v352_v0 }
  0x4d   :  { %261 = vmatpush1.bf16.msra.mxu0 %v260_v31 }
  0x4e   :  { %262 = vmatprep.subr.bf16.mxu0 %v352_v0 }
  0x51   :  { %264 = vmatpush1.bf16.msra.mxu0 %v263_v34 }
  0x52   :  { %265 = vmatprep.subr.bf16.mxu0 %v352_v0  ;;  %v229_v0 = vld [vmem:[%s432_s2] ss:$0 sm:$0xff] }
  0x55   :  { %267 = vmatpush1.bf16.msra.mxu0 %v266_v37 }
  0x58   :  { %146 = vmatmul.mubr.f32.vlgmr.msra.gmra.mrb[0].mxu0 %v44_v38 }
 0x12b   :  { %v147_v2 = vpop.f32.mrb[0].mxu0 }
 0x12c   :  { %v148_v3 = vadd.f32 %v229_v0, %v147_v2  ;;  %v149_v4 = vpop.f32.mrb[1].mxu0 }
 0x12e   :  { %v211_v5 = vadd.f32 %v209_v1, %v148_v3 }
 0x130   :  { %212 = vst [vmem:[#allocation7] sm:$0xff] %v211_v5 }
 0x131   :  { %331 = shalt.err (!%p328_p6)
}
 0x132   :  { %s332_s2 = scalar_lea.hbm %s434_s4, 128 }
 0x133   :  { %p333_p7 = scmp.ne.s32.totalorder %s434_s4, %s332_s2  ;;  %p336_p8 = scmp.lt.u32.totalorder %s332_s2, %s434_s4 }
 0x135   :  { %p338_p9 = pnand %p336_p8, %p333_p7 }
 0x137   :  { %341 = shalt.err (!%p338_p9)
}
 0x138   :  { %222 = dma.vmem_to_hbm [thread:$0]  %s220_s17, 128, %s434_s4, [#allocation4]  }
 0x139   :  { %346 = dma.done.wait [#allocation4], 128  }
 0x13a   :  { %347 = vsyncadd [#allocation4], 4294967168 }
 0x13b   :  { %226 = vsyncpa [#allocation3], 1 }
 0x13c   :  { %227 = vsyncpa [#allocation6], 1 }
 0x13d   :  { %228 = vsyncpa [#allocation4], 1 }

</bundles_post_ra>
